<compile_context>
chip_gen: v7x
topology: tpu7x:2x2x1
jax: 0.10.0
libtpu: 0.0.40
codegen_flags: <defaults>
</compile_context>

<pallas_src>
import jax
import jax.numpy as jnp
from jax import lax
from jax.experimental import pallas as pl
from jax.experimental.pallas import tpu as pltpu


def _fsa_kernel(ids_ref, fsa_ref, out_ref, hidden_ref):
    """One grid step == one chunk of T timesteps (grid is sequential over chunks).

    ids_ref    : VMEM (T*B, 1) int32 -- token ids of this chunk, row index t*B+b
    fsa_ref    : VMEM (V, S*S) f32   -- flattened FSA transition tensor (resident)
    out_ref    : VMEM (B, T*S) f32   -- hidden states of this chunk (lane-dense)
    hidden_ref : VMEM (B, S)  f32 scratch -- hidden state carried across chunks
    """
    c = pl.program_id(0)
    B, S = hidden_ref.shape
    V = fsa_ref.shape[0]
    T = ids_ref.shape[0] // B

    # h0 = onehot(state 0), broadcast over batch -- only before the first chunk.
    @pl.when(c == 0)
    def _():
        state = lax.broadcasted_iota(jnp.int32, (B, S), 1)
        hidden_ref[...] = (state == 0).astype(jnp.float32)

    # ---- Parallel part: gather all T*B transition matrices with ONE MXU matmul.
    # onehot(ids) @ fsa_flat : (T*B, V) @ (V, S*S) -> (T*B, S*S).
    # Row t*B+b holds fsa_tensor[ids[t, b]] flattened. Out-of-range ids produce
    # an all-zero one-hot row (zero transitions), never a wild VMEM read.
    ids = ids_ref[...]                                               # (T*B, 1)
    vocab = lax.broadcasted_iota(jnp.int32, (T * B, V), 1)
    onehot = (ids == vocab).astype(jnp.float32)                      # (T*B, V)
    gathered = jnp.dot(onehot, fsa_ref[...],
                       preferred_element_type=jnp.float32)           # (T*B, S*S)

    # ---- Serial part: tiny VPU-only recurrence over the chunk.
    # h_new[b, j] = sum_s h[b, s] * Tr_b[s, j], with Tr_b[s, :] stored at
    # gathered[t*B + b, s*S:(s+1)*S]; so each step is S broadcast FMAs over a
    # (B, S) tile plus one lane-contiguous (B, S) store. No reshapes needed.
    h = hidden_ref[...]                                              # (B, S)
    for t in range(T):                                               # unrolled
        blk = gathered[t * B:(t + 1) * B, :]                         # (B, S*S)
        acc = h[:, 0:1] * blk[:, 0:S]
        for s in range(1, S):
            acc = acc + h[:, s:s + 1] * blk[:, s * S:(s + 1) * S]
        h = acc
        out_ref[:, t * S:(t + 1) * S] = h                            # one store/step
    hidden_ref[...] = h


def fsa_integrate_onehot(ids, fsa_tensor, lengths=None, *, max_chunk=64):
    """Pallas implementation of FSAIntegrateOnehot.forward.

    ids        : (B, L) integer token ids
    fsa_tensor : (V, S, S) float32
    lengths    : unused (the PyTorch forward ignores it too)
    returns    : (B, L, S) float32 all hidden states
    """
    del lengths
    B, L = ids.shape
    V, S, _ = fsa_tensor.shape

    # Time-chunk size T: whole sequence when short; otherwise a value that keeps
    # the (T*B, 1) ids block and the (B, T*S) output block legal under the TPU
    # (8, 128) block-tiling rules (T % 8 == 0 and T*S % 128 == 0).
    if L <= max_chunk:
        chunk = L
    else:
        chunk = max_chunk
        while chunk % 8 != 0 or (chunk * S) % 128 != 0:
            chunk += 1
    l_pad = ((L + chunk - 1) // chunk) * chunk
    num_chunks = l_pad // chunk

    # Time-major flat ids: row index = t*B + b. Padded steps use token 0; their
    # outputs are sliced off below and cannot affect earlier timesteps.
    ids_tb = jnp.transpose(ids.astype(jnp.int32))            # (L, B)
    if l_pad != L:
        ids_tb = jnp.pad(ids_tb, ((0, l_pad - L), (0, 0)))
    ids_col = ids_tb.reshape(l_pad * B, 1)

    # (V, S*S) is the natural RHS layout for the one-hot gather matmul.
    fsa_flat = fsa_tensor.astype(jnp.float32).reshape(V, S * S)
    # TODO(synk): for large V (fsa_tensor >> VMEM, esp. v7x's 64 MiB/TC), keep
    # the tensor in HBM (memory_space=pl.ANY) and DMA-gather only the chunk's
    # token pages instead of keeping the whole (V, S*S) block resident.
    # TODO(synk): for v7x megacore, add a leading "parallel" grid axis over
    # batch chunks (one hidden scratch slice per chunk) to use both TensorCores.

    out_flat = pl.pallas_call(
        _fsa_kernel,
        out_shape=jax.ShapeDtypeStruct((B, l_pad * S), jnp.float32),
        grid_spec=pltpu.PrefetchScalarGridSpec(
            num_scalar_prefetch=0,
            grid=(num_chunks,),                                    # sequential over time
            in_specs=[
                pl.BlockSpec((chunk * B, 1), lambda c: (c, 0)),    # ids of chunk c
                pl.BlockSpec((V, S * S), lambda c: (0, 0)),        # resident FSA tensor
            ],
            out_specs=pl.BlockSpec((B, chunk * S), lambda c: (0, c)),
            scratch_shapes=[pltpu.VMEM((B, S), jnp.float32)],      # carried hidden state
        ),
        compiler_params=pltpu.CompilerParams(
            dimension_semantics=("arbitrary",),                    # chunks carry state
        ),
    )(ids_col, fsa_flat)

    # (B, L_pad*S) -> (B, L, S): PyTorch layout directly, no transpose needed.
    return out_flat[:, : L * S].reshape(B, L, S)


def _reference_forward(ids, fsa_tensor):
    """Pure-JAX reference mirroring the PyTorch loop."""
    B, L = ids.shape
    V, S, _ = fsa_tensor.shape
    h = jnp.zeros((B, S), jnp.float32).at[:, 0].set(1.0)
    outs = []
    for i in range(L):
        Tr = fsa_tensor[ids[:, i]]                       # (B, S, S)
        h = jnp.einsum("bs,bsj->bj", h, Tr)              # (B, S)
        outs.append(h)
    return jnp.stack(outs, axis=1)                       # (B, L, S)


if __name__ == "__main__":
    # Small, deterministic synthetic setup (no checkpoint loading).
    V, S = 16, 8          # vocab size, number of FSA states
    B, L = 2, 8           # batch, sequence length

    key = jax.random.PRNGKey(0)
    k_fsa, k_ids = jax.random.split(key)
    fsa_tensor = jax.random.uniform(k_fsa, (V, S, S), dtype=jnp.float32)
    ids = jax.random.randint(k_ids, (B, L), 0, V, dtype=jnp.int32)
    lengths = jnp.full((B,), L, dtype=jnp.int32)  # unused by forward, kept for parity

    out = jax.block_until_ready(fsa_integrate_onehot(ids, fsa_tensor, lengths))
    ref = _reference_forward(ids, fsa_tensor)
    assert out.shape == (B, L, S)
    assert jnp.allclose(out, ref, rtol=1e-5, atol=1e-5), "mismatch vs reference (short)"

    # Also exercise the multi-chunk path (L > chunk). The FSA is scaled so the
    # 100-step recurrence stays well inside f32 range.
    L2 = 100
    ids2 = jax.random.randint(jax.random.PRNGKey(1), (B, L2), 0, V, dtype=jnp.int32)
    fsa2 = fsa_tensor * (2.0 / S)
    out2 = jax.block_until_ready(fsa_integrate_onehot(ids2, fsa2))
    ref2 = _reference_forward(ids2, fsa2)
    assert out2.shape == (B, L2, S)
    assert jnp.allclose(out2, ref2, rtol=1e-3, atol=1e-5), "mismatch vs reference (long)"

    print("KERNEL_OK")
</pallas_src>

<mosaic_0001>
module attributes {stable_mosaic.version = 11 : i64} {
  func.func @_fsa_kernel(%arg0: i32, %arg1: memref<16x1xi32, #tpu.memory_space<vmem>>, %arg2: memref<16x64xf32, #tpu.memory_space<vmem>>, %arg3: memref<2x64xf32, #tpu.memory_space<vmem>>, %arg4: memref<2x8xf32, #tpu.memory_space<vmem>>) attributes {dimension_semantics = [#tpu.dimension_semantics<arbitrary>], iteration_bounds = array<i64: 1>, scalar_prefetch = 0 : i64, scratch_operands = 1 : i64, tpu.core_type = #tpu.core_type<tc>, window_params = [{transform_indices = @transform_0, window_bounds = array<i64: 16, 1>}, {pipeline_mode = #tpu.pipeline_mode<synchronous>, transform_indices = @transform_1, window_bounds = array<i64: 16, 64>}, {transform_indices = @transform_2, window_bounds = array<i64: 2, 64>}]} {
    %c0_i32 = arith.constant 0 : i32
    %0 = arith.cmpi eq, %arg0, %c0_i32 : i32
    %1 = arith.extui %0 : i1 to i32
    %c0_i32_0 = arith.constant 0 : i32
    %2 = arith.cmpi ne, %1, %c0_i32_0 : i32
    scf.if %2 {
      %341 = tpu.iota {dimensions = array<i32: 1>} : vector<2x8xi32>
      %c0_i32_17 = arith.constant 0 : i32
      %342 = vector.broadcast %c0_i32_17 : i32 to vector<2x8xi32>
      %343 = arith.cmpi eq, %341, %342 : vector<2x8xi32>
      %344 = arith.extui %343 : vector<2x8xi1> to vector<2x8xi32>
      %345 = arith.sitofp %344 : vector<2x8xi32> to vector<2x8xf32>
      %c0_18 = arith.constant 0 : index
      %c0_19 = arith.constant 0 : index
      %346 = vector.load %arg4[%c0_18, %c0_19] : memref<2x8xf32, #tpu.memory_space<vmem>>, vector<2x8xf32>
      tpu.vector_store %arg4[%c0_18, %c0_19], %345 {strides = array<i32>} : memref<2x8xf32, #tpu.memory_space<vmem>>, vector<2x8xf32>,
    } else {
    }
    %c0 = arith.constant 0 : index
    %c0_1 = arith.constant 0 : index
    %3 = vector.load %arg1[%c0, %c0_1] : memref<16x1xi32, #tpu.memory_space<vmem>>, vector<16x1xi32>
    %4 = tpu.iota {dimensions = array<i32: 1>} : vector<16x16xi32>
    %5 = vector.broadcast %3 : vector<16x1xi32> to vector<16x16xi32>
    %6 = arith.cmpi eq, %5, %4 : vector<16x16xi32>
    %7 = arith.extui %6 : vector<16x16xi1> to vector<16x16xi32>
    %8 = arith.sitofp %7 : vector<16x16xi32> to vector<16x16xf32>
    %c0_2 = arith.constant 0 : index
    %c0_3 = arith.constant 0 : index
    %9 = vector.load %arg2[%c0_2, %c0_3] : memref<16x64xf32, #tpu.memory_space<vmem>>, vector<16x64xf32>
    %cst = arith.constant dense<0.000000e+00> : vector<16x64xf32>
    %10 = tpu.matmul %8, %9, %cst {dimension_numbers = #tpu.dot_dimension_numbers<[1], [0], [0], [1], [0, 0, 1, 1], [], []>} : vector<16x16xf32>, vector<16x64xf32>, vector<16x64xf32> -> vector<16x64xf32>
    %c0_4 = arith.constant 0 : index
    %c0_5 = arith.constant 0 : index
    %11 = vector.load %arg4[%c0_4, %c0_5] : memref<2x8xf32, #tpu.memory_space<vmem>>, vector<2x8xf32>
    %12 = vector.extract_strided_slice %10 {offsets = [0, 0], sizes = [2, 64], strides = [1, 1]} : vector<16x64xf32> to vector<2x64xf32>
    %13 = vector.extract_strided_slice %11 {offsets = [0, 0], sizes = [2, 1], strides = [1, 1]} : vector<2x8xf32> to vector<2x1xf32>
    %14 = vector.extract_strided_slice %12 {offsets = [0, 0], sizes = [2, 8], strides = [1, 1]} : vector<2x64xf32> to vector<2x8xf32>
    %15 = vector.broadcast %13 : vector<2x1xf32> to vector<2x8xf32>
    %16 = arith.mulf %15, %14 : vector<2x8xf32>
    %17 = vector.extract_strided_slice %11 {offsets = [0, 1], sizes = [2, 1], strides = [1, 1]} : vector<2x8xf32> to vector<2x1xf32>
    %18 = vector.extract_strided_slice %12 {offsets = [0, 8], sizes = [2, 8], strides = [1, 1]} : vector<2x64xf32> to vector<2x8xf32>
    %19 = vector.broadcast %17 : vector<2x1xf32> to vector<2x8xf32>
    %20 = arith.mulf %19, %18 : vector<2x8xf32>
    %21 = arith.addf %16, %20 : vector<2x8xf32>
    %22 = vector.extract_strided_slice %11 {offsets = [0, 2], sizes = [2, 1], strides = [1, 1]} : vector<2x8xf32> to vector<2x1xf32>
    %23 = vector.extract_strided_slice %12 {offsets = [0, 16], sizes = [2, 8], strides = [1, 1]} : vector<2x64xf32> to vector<2x8xf32>
    %24 = vector.broadcast %22 : vector<2x1xf32> to vector<2x8xf32>
    %25 = arith.mulf %24, %23 : vector<2x8xf32>
    %26 = arith.addf %21, %25 : vector<2x8xf32>
    %27 = vector.extract_strided_slice %11 {offsets = [0, 3], sizes = [2, 1], strides = [1, 1]} : vector<2x8xf32> to vector<2x1xf32>
    %28 = vector.extract_strided_slice %12 {offsets = [0, 24], sizes = [2, 8], strides = [1, 1]} : vector<2x64xf32> to vector<2x8xf32>
    %29 = vector.broadcast %27 : vector<2x1xf32> to vector<2x8xf32>
    %30 = arith.mulf %29, %28 : vector<2x8xf32>
    %31 = arith.addf %26, %30 : vector<2x8xf32>
    %32 = vector.extract_strided_slice %11 {offsets = [0, 4], sizes = [2, 1], strides = [1, 1]} : vector<2x8xf32> to vector<2x1xf32>
    %33 = vector.extract_strided_slice %12 {offsets = [0, 32], sizes = [2, 8], strides = [1, 1]} : vector<2x64xf32> to vector<2x8xf32>
    %34 = vector.broadcast %32 : vector<2x1xf32> to vector<2x8xf32>
    %35 = arith.mulf %34, %33 : vector<2x8xf32>
    %36 = arith.addf %31, %35 : vector<2x8xf32>
    %37 = vector.extract_strided_slice %11 {offsets = [0, 5], sizes = [2, 1], strides = [1, 1]} : vector<2x8xf32> to vector<2x1xf32>
    %38 = vector.extract_strided_slice %12 {offsets = [0, 40], sizes = [2, 8], strides = [1, 1]} : vector<2x64xf32> to vector<2x8xf32>
    %39 = vector.broadcast %37 : vector<2x1xf32> to vector<2x8xf32>
    %40 = arith.mulf %39, %38 : vector<2x8xf32>
    %41 = arith.addf %36, %40 : vector<2x8xf32>
    %42 = vector.extract_strided_slice %11 {offsets = [0, 6], sizes = [2, 1], strides = [1, 1]} : vector<2x8xf32> to vector<2x1xf32>
    %43 = vector.extract_strided_slice %12 {offsets = [0, 48], sizes = [2, 8], strides = [1, 1]} : vector<2x64xf32> to vector<2x8xf32>
    %44 = vector.broadcast %42 : vector<2x1xf32> to vector<2x8xf32>
    %45 = arith.mulf %44, %43 : vector<2x8xf32>
    %46 = arith.addf %41, %45 : vector<2x8xf32>
    %47 = vector.extract_strided_slice %11 {offsets = [0, 7], sizes = [2, 1], strides = [1, 1]} : vector<2x8xf32> to vector<2x1xf32>
    %48 = vector.extract_strided_slice %12 {offsets = [0, 56], sizes = [2, 8], strides = [1, 1]} : vector<2x64xf32> to vector<2x8xf32>
    %49 = vector.broadcast %47 : vector<2x1xf32> to vector<2x8xf32>
    %50 = arith.mulf %49, %48 : vector<2x8xf32>
    %51 = arith.addf %46, %50 : vector<2x8xf32>
    %c0_6 = arith.constant 0 : index
    %c0_7 = arith.constant 0 : index
    %52 = vector.load %arg3[%c0_6, %c0_7] : memref<2x64xf32, #tpu.memory_space<vmem>>, vector<2x8xf32>
    tpu.vector_store %arg3[%c0_6, %c0_7], %51 {strides = array<i32>} : memref<2x64xf32, #tpu.memory_space<vmem>>, vector<2x8xf32>,
    %53 = vector.extract_strided_slice %10 {offsets = [2, 0], sizes = [2, 64], strides = [1, 1]} : vector<16x64xf32> to vector<2x64xf32>
    %54 = vector.extract_strided_slice %51 {offsets = [0, 0], sizes = [2, 1], strides = [1, 1]} : vector<2x8xf32> to vector<2x1xf32>
    %55 = vector.extract_strided_slice %53 {offsets = [0, 0], sizes = [2, 8], strides = [1, 1]} : vector<2x64xf32> to vector<2x8xf32>
    %56 = vector.broadcast %54 : vector<2x1xf32> to vector<2x8xf32>
    %57 = arith.mulf %56, %55 : vector<2x8xf32>
    %58 = vector.extract_strided_slice %51 {offsets = [0, 1], sizes = [2, 1], strides = [1, 1]} : vector<2x8xf32> to vector<2x1xf32>
    %59 = vector.extract_strided_slice %53 {offsets = [0, 8], sizes = [2, 8], strides = [1, 1]} : vector<2x64xf32> to vector<2x8xf32>
    %60 = vector.broadcast %58 : vector<2x1xf32> to vector<2x8xf32>
    %61 = arith.mulf %60, %59 : vector<2x8xf32>
    %62 = arith.addf %57, %61 : vector<2x8xf32>
    %63 = vector.extract_strided_slice %51 {offsets = [0, 2], sizes = [2, 1], strides = [1, 1]} : vector<2x8xf32> to vector<2x1xf32>
    %64 = vector.extract_strided_slice %53 {offsets = [0, 16], sizes = [2, 8], strides = [1, 1]} : vector<2x64xf32> to vector<2x8xf32>
    %65 = vector.broadcast %63 : vector<2x1xf32> to vector<2x8xf32>
    %66 = arith.mulf %65, %64 : vector<2x8xf32>
    %67 = arith.addf %62, %66 : vector<2x8xf32>
    %68 = vector.extract_strided_slice %51 {offsets = [0, 3], sizes = [2, 1], strides = [1, 1]} : vector<2x8xf32> to vector<2x1xf32>
    %69 = vector.extract_strided_slice %53 {offsets = [0, 24], sizes = [2, 8], strides = [1, 1]} : vector<2x64xf32> to vector<2x8xf32>
    %70 = vector.broadcast %68 : vector<2x1xf32> to vector<2x8xf32>
    %71 = arith.mulf %70, %69 : vector<2x8xf32>
    %72 = arith.addf %67, %71 : vector<2x8xf32>
    %73 = vector.extract_strided_slice %51 {offsets = [0, 4], sizes = [2, 1], strides = [1, 1]} : vector<2x8xf32> to vector<2x1xf32>
    %74 = vector.extract_strided_slice %53 {offsets = [0, 32], sizes = [2, 8], strides = [1, 1]} : vector<2x64xf32> to vector<2x8xf32>
    %75 = vector.broadcast %73 : vector<2x1xf32> to vector<2x8xf32>
    %76 = arith.mulf %75, %74 : vector<2x8xf32>
    %77 = arith.addf %72, %76 : vector<2x8xf32>
    %78 = vector.extract_strided_slice %51 {offsets = [0, 5], sizes = [2, 1], strides = [1, 1]} : vector<2x8xf32> to vector<2x1xf32>
    %79 = vector.extract_strided_slice %53 {offsets = [0, 40], sizes = [2, 8], strides = [1, 1]} : vector<2x64xf32> to vector<2x8xf32>
    %80 = vector.broadcast %78 : vector<2x1xf32> to vector<2x8xf32>
    %81 = arith.mulf %80, %79 : vector<2x8xf32>
    %82 = arith.addf %77, %81 : vector<2x8xf32>
    %83 = vector.extract_strided_slice %51 {offsets = [0, 6], sizes = [2, 1], strides = [1, 1]} : vector<2x8xf32> to vector<2x1xf32>
    %84 = vector.extract_strided_slice %53 {offsets = [0, 48], sizes = [2, 8], strides = [1, 1]} : vector<2x64xf32> to vector<2x8xf32>
    %85 = vector.broadcast %83 : vector<2x1xf32> to vector<2x8xf32>
    %86 = arith.mulf %85, %84 : vector<2x8xf32>
    %87 = arith.addf %82, %86 : vector<2x8xf32>
    %88 = vector.extract_strided_slice %51 {offsets = [0, 7], sizes = [2, 1], strides = [1, 1]} : vector<2x8xf32> to vector<2x1xf32>
    %89 = vector.extract_strided_slice %53 {offsets = [0, 56], sizes = [2, 8], strides = [1, 1]} : vector<2x64xf32> to vector<2x8xf32>
    %90 = vector.broadcast %88 : vector<2x1xf32> to vector<2x8xf32>
    %91 = arith.mulf %90, %89 : vector<2x8xf32>
    %92 = arith.addf %87, %91 : vector<2x8xf32>
    %c0_8 = arith.constant 0 : index
    %c8 = arith.constant 8 : index
    %93 = vector.load %arg3[%c0_8, %c8] : memref<2x64xf32, #tpu.memory_space<vmem>>, vector<2x8xf32>
    tpu.vector_store %arg3[%c0_8, %c8], %92 {strides = array<i32>} : memref<2x64xf32, #tpu.memory_space<vmem>>, vector<2x8xf32>,
    %94 = vector.extract_strided_slice %10 {offsets = [4, 0], sizes = [2, 64], strides = [1, 1]} : vector<16x64xf32> to vector<2x64xf32>
    %95 = vector.extract_strided_slice %92 {offsets = [0, 0], sizes = [2, 1], strides = [1, 1]} : vector<2x8xf32> to vector<2x1xf32>
    %96 = vector.extract_strided_slice %94 {offsets = [0, 0], sizes = [2, 8], strides = [1, 1]} : vector<2x64xf32> to vector<2x8xf32>
    %97 = vector.broadcast %95 : vector<2x1xf32> to vector<2x8xf32>
    %98 = arith.mulf %97, %96 : vector<2x8xf32>
    %99 = vector.extract_strided_slice %92 {offsets = [0, 1], sizes = [2, 1], strides = [1, 1]} : vector<2x8xf32> to vector<2x1xf32>
    %100 = vector.extract_strided_slice %94 {offsets = [0, 8], sizes = [2, 8], strides = [1, 1]} : vector<2x64xf32> to vector<2x8xf32>
    %101 = vector.broadcast %99 : vector<2x1xf32> to vector<2x8xf32>
    %102 = arith.mulf %101, %100 : vector<2x8xf32>
    %103 = arith.addf %98, %102 : vector<2x8xf32>
    %104 = vector.extract_strided_slice %92 {offsets = [0, 2], sizes = [2, 1], strides = [1, 1]} : vector<2x8xf32> to vector<2x1xf32>
    %105 = vector.extract_strided_slice %94 {offsets = [0, 16], sizes = [2, 8], strides = [1, 1]} : vector<2x64xf32> to vector<2x8xf32>
    %106 = vector.broadcast %104 : vector<2x1xf32> to vector<2x8xf32>
    %107 = arith.mulf %106, %105 : vector<2x8xf32>
    %108 = arith.addf %103, %107 : vector<2x8xf32>
    %109 = vector.extract_strided_slice %92 {offsets = [0, 3], sizes = [2, 1], strides = [1, 1]} : vector<2x8xf32> to vector<2x1xf32>
    %110 = vector.extract_strided_slice %94 {offsets = [0, 24], sizes = [2, 8], strides = [1, 1]} : vector<2x64xf32> to vector<2x8xf32>
    %111 = vector.broadcast %109 : vector<2x1xf32> to vector<2x8xf32>
    %112 = arith.mulf %111, %110 : vector<2x8xf32>
    %113 = arith.addf %108, %112 : vector<2x8xf32>
    %114 = vector.extract_strided_slice %92 {offsets = [0, 4], sizes = [2, 1], strides = [1, 1]} : vector<2x8xf32> to vector<2x1xf32>
    %115 = vector.extract_strided_slice %94 {offsets = [0, 32], sizes = [2, 8], strides = [1, 1]} : vector<2x64xf32> to vector<2x8xf32>
    %116 = vector.broadcast %114 : vector<2x1xf32> to vector<2x8xf32>
    %117 = arith.mulf %116, %115 : vector<2x8xf32>
    %118 = arith.addf %113, %117 : vector<2x8xf32>
    %119 = vector.extract_strided_slice %92 {offsets = [0, 5], sizes = [2, 1], strides = [1, 1]} : vector<2x8xf32> to vector<2x1xf32>
    %120 = vector.extract_strided_slice %94 {offsets = [0, 40], sizes = [2, 8], strides = [1, 1]} : vector<2x64xf32> to vector<2x8xf32>
    %121 = vector.broadcast %119 : vector<2x1xf32> to vector<2x8xf32>
    %122 = arith.mulf %121, %120 : vector<2x8xf32>
    %123 = arith.addf %118, %122 : vector<2x8xf32>
    %124 = vector.extract_strided_slice %92 {offsets = [0, 6], sizes = [2, 1], strides = [1, 1]} : vector<2x8xf32> to vector<2x1xf32>
    %125 = vector.extract_strided_slice %94 {offsets = [0, 48], sizes = [2, 8], strides = [1, 1]} : vector<2x64xf32> to vector<2x8xf32>
    %126 = vector.broadcast %124 : vector<2x1xf32> to vector<2x8xf32>
    %127 = arith.mulf %126, %125 : vector<2x8xf32>
    %128 = arith.addf %123, %127 : vector<2x8xf32>
    %129 = vector.extract_strided_slice %92 {offsets = [0, 7], sizes = [2, 1], strides = [1, 1]} : vector<2x8xf32> to vector<2x1xf32>
    %130 = vector.extract_strided_slice %94 {offsets = [0, 56], sizes = [2, 8], strides = [1, 1]} : vector<2x64xf32> to vector<2x8xf32>
    %131 = vector.broadcast %129 : vector<2x1xf32> to vector<2x8xf32>
    %132 = arith.mulf %131, %130 : vector<2x8xf32>
    %133 = arith.addf %128, %132 : vector<2x8xf32>
    %c0_9 = arith.constant 0 : index
    %c16 = arith.constant 16 : index
    %134 = vector.load %arg3[%c0_9, %c16] : memref<2x64xf32, #tpu.memory_space<vmem>>, vector<2x8xf32>
    tpu.vector_store %arg3[%c0_9, %c16], %133 {strides = array<i32>} : memref<2x64xf32, #tpu.memory_space<vmem>>, vector<2x8xf32>,
    %135 = vector.extract_strided_slice %10 {offsets = [6, 0], sizes = [2, 64], strides = [1, 1]} : vector<16x64xf32> to vector<2x64xf32>
    %136 = vector.extract_strided_slice %133 {offsets = [0, 0], sizes = [2, 1], strides = [1, 1]} : vector<2x8xf32> to vector<2x1xf32>
    %137 = vector.extract_strided_slice %135 {offsets = [0, 0], sizes = [2, 8], strides = [1, 1]} : vector<2x64xf32> to vector<2x8xf32>
    %138 = vector.broadcast %136 : vector<2x1xf32> to vector<2x8xf32>
    %139 = arith.mulf %138, %137 : vector<2x8xf32>
    %140 = vector.extract_strided_slice %133 {offsets = [0, 1], sizes = [2, 1], strides = [1, 1]} : vector<2x8xf32> to vector<2x1xf32>
    %141 = vector.extract_strided_slice %135 {offsets = [0, 8], sizes = [2, 8], strides = [1, 1]} : vector<2x64xf32> to vector<2x8xf32>
    %142 = vector.broadcast %140 : vector<2x1xf32> to vector<2x8xf32>
    %143 = arith.mulf %142, %141 : vector<2x8xf32>
    %144 = arith.addf %139, %143 : vector<2x8xf32>
    %145 = vector.extract_strided_slice %133 {offsets = [0, 2], sizes = [2, 1], strides = [1, 1]} : vector<2x8xf32> to vector<2x1xf32>
    %146 = vector.extract_strided_slice %135 {offsets = [0, 16], sizes = [2, 8], strides = [1, 1]} : vector<2x64xf32> to vector<2x8xf32>
    %147 = vector.broadcast %145 : vector<2x1xf32> to vector<2x8xf32>
    %148 = arith.mulf %147, %146 : vector<2x8xf32>
    %149 = arith.addf %144, %148 : vector<2x8xf32>
    %150 = vector.extract_strided_slice %133 {offsets = [0, 3], sizes = [2, 1], strides = [1, 1]} : vector<2x8xf32> to vector<2x1xf32>
    %151 = vector.extract_strided_slice %135 {offsets = [0, 24], sizes = [2, 8], strides = [1, 1]} : vector<2x64xf32> to vector<2x8xf32>
    %152 = vector.broadcast %150 : vector<2x1xf32> to vector<2x8xf32>
    %153 = arith.mulf %152, %151 : vector<2x8xf32>
    %154 = arith.addf %149, %153 : vector<2x8xf32>
    %155 = vector.extract_strided_slice %133 {offsets = [0, 4], sizes = [2, 1], strides = [1, 1]} : vector<2x8xf32> to vector<2x1xf32>
    %156 = vector.extract_strided_slice %135 {offsets = [0, 32], sizes = [2, 8], strides = [1, 1]} : vector<2x64xf32> to vector<2x8xf32>
    %157 = vector.broadcast %155 : vector<2x1xf32> to vector<2x8xf32>
    %158 = arith.mulf %157, %156 : vector<2x8xf32>
    %159 = arith.addf %154, %158 : vector<2x8xf32>
    %160 = vector.extract_strided_slice %133 {offsets = [0, 5], sizes = [2, 1], strides = [1, 1]} : vector<2x8xf32> to vector<2x1xf32>
    %161 = vector.extract_strided_slice %135 {offsets = [0, 40], sizes = [2, 8], strides = [1, 1]} : vector<2x64xf32> to vector<2x8xf32>
    %162 = vector.broadcast %160 : vector<2x1xf32> to vector<2x8xf32>
    %163 = arith.mulf %162, %161 : vector<2x8xf32>
    %164 = arith.addf %159, %163 : vector<2x8xf32>
    %165 = vector.extract_strided_slice %133 {offsets = [0, 6], sizes = [2, 1], strides = [1, 1]} : vector<2x8xf32> to vector<2x1xf32>
    %166 = vector.extract_strided_slice %135 {offsets = [0, 48], sizes = [2, 8], strides = [1, 1]} : vector<2x64xf32> to vector<2x8xf32>
    %167 = vector.broadcast %165 : vector<2x1xf32> to vector<2x8xf32>
    %168 = arith.mulf %167, %166 : vector<2x8xf32>
    %169 = arith.addf %164, %168 : vector<2x8xf32>
    %170 = vector.extract_strided_slice %133 {offsets = [0, 7], sizes = [2, 1], strides = [1, 1]} : vector<2x8xf32> to vector<2x1xf32>
    %171 = vector.extract_strided_slice %135 {offsets = [0, 56], sizes = [2, 8], strides = [1, 1]} : vector<2x64xf32> to vector<2x8xf32>
    %172 = vector.broadcast %170 : vector<2x1xf32> to vector<2x8xf32>
    %173 = arith.mulf %172, %171 : vector<2x8xf32>
    %174 = arith.addf %169, %173 : vector<2x8xf32>
    %c0_10 = arith.constant 0 : index
    %c24 = arith.constant 24 : index
    %175 = vector.load %arg3[%c0_10, %c24] : memref<2x64xf32, #tpu.memory_space<vmem>>, vector<2x8xf32>
    tpu.vector_store %arg3[%c0_10, %c24], %174 {strides = array<i32>} : memref<2x64xf32, #tpu.memory_space<vmem>>, vector<2x8xf32>,
    %176 = vector.extract_strided_slice %10 {offsets = [8, 0], sizes = [2, 64], strides = [1, 1]} : vector<16x64xf32> to vector<2x64xf32>
    %177 = vector.extract_strided_slice %174 {offsets = [0, 0], sizes = [2, 1], strides = [1, 1]} : vector<2x8xf32> to vector<2x1xf32>
    %178 = vector.extract_strided_slice %176 {offsets = [0, 0], sizes = [2, 8], strides = [1, 1]} : vector<2x64xf32> to vector<2x8xf32>
    %179 = vector.broadcast %177 : vector<2x1xf32> to vector<2x8xf32>
    %180 = arith.mulf %179, %178 : vector<2x8xf32>
    %181 = vector.extract_strided_slice %174 {offsets = [0, 1], sizes = [2, 1], strides = [1, 1]} : vector<2x8xf32> to vector<2x1xf32>
    %182 = vector.extract_strided_slice %176 {offsets = [0, 8], sizes = [2, 8], strides = [1, 1]} : vector<2x64xf32> to vector<2x8xf32>
    %183 = vector.broadcast %181 : vector<2x1xf32> to vector<2x8xf32>
    %184 = arith.mulf %183, %182 : vector<2x8xf32>
    %185 = arith.addf %180, %184 : vector<2x8xf32>
    %186 = vector.extract_strided_slice %174 {offsets = [0, 2], sizes = [2, 1], strides = [1, 1]} : vector<2x8xf32> to vector<2x1xf32>
    %187 = vector.extract_strided_slice %176 {offsets = [0, 16], sizes = [2, 8], strides = [1, 1]} : vector<2x64xf32> to vector<2x8xf32>
    %188 = vector.broadcast %186 : vector<2x1xf32> to vector<2x8xf32>
    %189 = arith.mulf %188, %187 : vector<2x8xf32>
    %190 = arith.addf %185, %189 : vector<2x8xf32>
    %191 = vector.extract_strided_slice %174 {offsets = [0, 3], sizes = [2, 1], strides = [1, 1]} : vector<2x8xf32> to vector<2x1xf32>
    %192 = vector.extract_strided_slice %176 {offsets = [0, 24], sizes = [2, 8], strides = [1, 1]} : vector<2x64xf32> to vector<2x8xf32>
    %193 = vector.broadcast %191 : vector<2x1xf32> to vector<2x8xf32>
    %194 = arith.mulf %193, %192 : vector<2x8xf32>
    %195 = arith.addf %190, %194 : vector<2x8xf32>
    %196 = vector.extract_strided_slice %174 {offsets = [0, 4], sizes = [2, 1], strides = [1, 1]} : vector<2x8xf32> to vector<2x1xf32>
    %197 = vector.extract_strided_slice %176 {offsets = [0, 32], sizes = [2, 8], strides = [1, 1]} : vector<2x64xf32> to vector<2x8xf32>
    %198 = vector.broadcast %196 : vector<2x1xf32> to vector<2x8xf32>
    %199 = arith.mulf %198, %197 : vector<2x8xf32>
    %200 = arith.addf %195, %199 : vector<2x8xf32>
    %201 = vector.extract_strided_slice %174 {offsets = [0, 5], sizes = [2, 1], strides = [1, 1]} : vector<2x8xf32> to vector<2x1xf32>
    %202 = vector.extract_strided_slice %176 {offsets = [0, 40], sizes = [2, 8], strides = [1, 1]} : vector<2x64xf32> to vector<2x8xf32>
    %203 = vector.broadcast %201 : vector<2x1xf32> to vector<2x8xf32>
    %204 = arith.mulf %203, %202 : vector<2x8xf32>
    %205 = arith.addf %200, %204 : vector<2x8xf32>
    %206 = vector.extract_strided_slice %174 {offsets = [0, 6], sizes = [2, 1], strides = [1, 1]} : vector<2x8xf32> to vector<2x1xf32>
    %207 = vector.extract_strided_slice %176 {offsets = [0, 48], sizes = [2, 8], strides = [1, 1]} : vector<2x64xf32> to vector<2x8xf32>
    %208 = vector.broadcast %206 : vector<2x1xf32> to vector<2x8xf32>
    %209 = arith.mulf %208, %207 : vector<2x8xf32>
    %210 = arith.addf %205, %209 : vector<2x8xf32>
    %211 = vector.extract_strided_slice %174 {offsets = [0, 7], sizes = [2, 1], strides = [1, 1]} : vector<2x8xf32> to vector<2x1xf32>
    %212 = vector.extract_strided_slice %176 {offsets = [0, 56], sizes = [2, 8], strides = [1, 1]} : vector<2x64xf32> to vector<2x8xf32>
    %213 = vector.broadcast %211 : vector<2x1xf32> to vector<2x8xf32>
    %214 = arith.mulf %213, %212 : vector<2x8xf32>
    %215 = arith.addf %210, %214 : vector<2x8xf32>
    %c0_11 = arith.constant 0 : index
    %c32 = arith.constant 32 : index
    %216 = vector.load %arg3[%c0_11, %c32] : memref<2x64xf32, #tpu.memory_space<vmem>>, vector<2x8xf32>
    tpu.vector_store %arg3[%c0_11, %c32], %215 {strides = array<i32>} : memref<2x64xf32, #tpu.memory_space<vmem>>, vector<2x8xf32>,
    %217 = vector.extract_strided_slice %10 {offsets = [10, 0], sizes = [2, 64], strides = [1, 1]} : vector<16x64xf32> to vector<2x64xf32>
    %218 = vector.extract_strided_slice %215 {offsets = [0, 0], sizes = [2, 1], strides = [1, 1]} : vector<2x8xf32> to vector<2x1xf32>
    %219 = vector.extract_strided_slice %217 {offsets = [0, 0], sizes = [2, 8], strides = [1, 1]} : vector<2x64xf32> to vector<2x8xf32>
    %220 = vector.broadcast %218 : vector<2x1xf32> to vector<2x8xf32>
    %221 = arith.mulf %220, %219 : vector<2x8xf32>
    %222 = vector.extract_strided_slice %215 {offsets = [0, 1], sizes = [2, 1], strides = [1, 1]} : vector<2x8xf32> to vector<2x1xf32>
    %223 = vector.extract_strided_slice %217 {offsets = [0, 8], sizes = [2, 8], strides = [1, 1]} : vector<2x64xf32> to vector<2x8xf32>
    %224 = vector.broadcast %222 : vector<2x1xf32> to vector<2x8xf32>
    %225 = arith.mulf %224, %223 : vector<2x8xf32>
    %226 = arith.addf %221, %225 : vector<2x8xf32>
    %227 = vector.extract_strided_slice %215 {offsets = [0, 2], sizes = [2, 1], strides = [1, 1]} : vector<2x8xf32> to vector<2x1xf32>
    %228 = vector.extract_strided_slice %217 {offsets = [0, 16], sizes = [2, 8], strides = [1, 1]} : vector<2x64xf32> to vector<2x8xf32>
    %229 = vector.broadcast %227 : vector<2x1xf32> to vector<2x8xf32>
    %230 = arith.mulf %229, %228 : vector<2x8xf32>
    %231 = arith.addf %226, %230 : vector<2x8xf32>
    %232 = vector.extract_strided_slice %215 {offsets = [0, 3], sizes = [2, 1], strides = [1, 1]} : vector<2x8xf32> to vector<2x1xf32>
    %233 = vector.extract_strided_slice %217 {offsets = [0, 24], sizes = [2, 8], strides = [1, 1]} : vector<2x64xf32> to vector<2x8xf32>
    %234 = vector.broadcast %232 : vector<2x1xf32> to vector<2x8xf32>
    %235 = arith.mulf %234, %233 : vector<2x8xf32>
    %236 = arith.addf %231, %235 : vector<2x8xf32>
    %237 = vector.extract_strided_slice %215 {offsets = [0, 4], sizes = [2, 1], strides = [1, 1]} : vector<2x8xf32> to vector<2x1xf32>
    %238 = vector.extract_strided_slice %217 {offsets = [0, 32], sizes = [2, 8], strides = [1, 1]} : vector<2x64xf32> to vector<2x8xf32>
    %239 = vector.broadcast %237 : vector<2x1xf32> to vector<2x8xf32>
    %240 = arith.mulf %239, %238 : vector<2x8xf32>
    %241 = arith.addf %236, %240 : vector<2x8xf32>
    %242 = vector.extract_strided_slice %215 {offsets = [0, 5], sizes = [2, 1], strides = [1, 1]} : vector<2x8xf32> to vector<2x1xf32>
    %243 = vector.extract_strided_slice %217 {offsets = [0, 40], sizes = [2, 8], strides = [1, 1]} : vector<2x64xf32> to vector<2x8xf32>
    %244 = vector.broadcast %242 : vector<2x1xf32> to vector<2x8xf32>
    %245 = arith.mulf %244, %243 : vector<2x8xf32>
    %246 = arith.addf %241, %245 : vector<2x8xf32>
    %247 = vector.extract_strided_slice %215 {offsets = [0, 6], sizes = [2, 1], strides = [1, 1]} : vector<2x8xf32> to vector<2x1xf32>
    %248 = vector.extract_strided_slice %217 {offsets = [0, 48], sizes = [2, 8], strides = [1, 1]} : vector<2x64xf32> to vector<2x8xf32>
    %249 = vector.broadcast %247 : vector<2x1xf32> to vector<2x8xf32>
    %250 = arith.mulf %249, %248 : vector<2x8xf32>
    %251 = arith.addf %246, %250 : vector<2x8xf32>
    %252 = vector.extract_strided_slice %215 {offsets = [0, 7], sizes = [2, 1], strides = [1, 1]} : vector<2x8xf32> to vector<2x1xf32>
    %253 = vector.extract_strided_slice %217 {offsets = [0, 56], sizes = [2, 8], strides = [1, 1]} : vector<2x64xf32> to vector<2x8xf32>
    %254 = vector.broadcast %252 : vector<2x1xf32> to vector<2x8xf32>
    %255 = arith.mulf %254, %253 : vector<2x8xf32>
    %256 = arith.addf %251, %255 : vector<2x8xf32>
    %c0_12 = arith.constant 0 : index
    %c40 = arith.constant 40 : index
    %257 = vector.load %arg3[%c0_12, %c40] : memref<2x64xf32, #tpu.memory_space<vmem>>, vector<2x8xf32>
    tpu.vector_store %arg3[%c0_12, %c40], %256 {strides = array<i32>} : memref<2x64xf32, #tpu.memory_space<vmem>>, vector<2x8xf32>,
    %258 = vector.extract_strided_slice %10 {offsets = [12, 0], sizes = [2, 64], strides = [1, 1]} : vector<16x64xf32> to vector<2x64xf32>
    %259 = vector.extract_strided_slice %256 {offsets = [0, 0], sizes = [2, 1], strides = [1, 1]} : vector<2x8xf32> to vector<2x1xf32>
    %260 = vector.extract_strided_slice %258 {offsets = [0, 0], sizes = [2, 8], strides = [1, 1]} : vector<2x64xf32> to vector<2x8xf32>
    %261 = vector.broadcast %259 : vector<2x1xf32> to vector<2x8xf32>
    %262 = arith.mulf %261, %260 : vector<2x8xf32>
    %263 = vector.extract_strided_slice %256 {offsets = [0, 1], sizes = [2, 1], strides = [1, 1]} : vector<2x8xf32> to vector<2x1xf32>
    %264 = vector.extract_strided_slice %258 {offsets = [0, 8], sizes = [2, 8], strides = [1, 1]} : vector<2x64xf32> to vector<2x8xf32>
    %265 = vector.broadcast %263 : vector<2x1xf32> to vector<2x8xf32>
    %266 = arith.mulf %265, %264 : vector<2x8xf32>
    %267 = arith.addf %262, %266 : vector<2x8xf32>
    %268 = vector.extract_strided_slice %256 {offsets = [0, 2], sizes = [2, 1], strides = [1, 1]} : vector<2x8xf32> to vector<2x1xf32>
    %269 = vector.extract_strided_slice %258 {offsets = [0, 16], sizes = [2, 8], strides = [1, 1]} : vector<2x64xf32> to vector<2x8xf32>
    %270 = vector.broadcast %268 : vector<2x1xf32> to vector<2x8xf32>
    %271 = arith.mulf %270, %269 : vector<2x8xf32>
    %272 = arith.addf %267, %271 : vector<2x8xf32>
    %273 = vector.extract_strided_slice %256 {offsets = [0, 3], sizes = [2, 1], strides = [1, 1]} : vector<2x8xf32> to vector<2x1xf32>
    %274 = vector.extract_strided_slice %258 {offsets = [0, 24], sizes = [2, 8], strides = [1, 1]} : vector<2x64xf32> to vector<2x8xf32>
    %275 = vector.broadcast %273 : vector<2x1xf32> to vector<2x8xf32>
    %276 = arith.mulf %275, %274 : vector<2x8xf32>
    %277 = arith.addf %272, %276 : vector<2x8xf32>
    %278 = vector.extract_strided_slice %256 {offsets = [0, 4], sizes = [2, 1], strides = [1, 1]} : vector<2x8xf32> to vector<2x1xf32>
    %279 = vector.extract_strided_slice %258 {offsets = [0, 32], sizes = [2, 8], strides = [1, 1]} : vector<2x64xf32> to vector<2x8xf32>
    %280 = vector.broadcast %278 : vector<2x1xf32> to vector<2x8xf32>
    %281 = arith.mulf %280, %279 : vector<2x8xf32>
    %282 = arith.addf %277, %281 : vector<2x8xf32>
    %283 = vector.extract_strided_slice %256 {offsets = [0, 5], sizes = [2, 1], strides = [1, 1]} : vector<2x8xf32> to vector<2x1xf32>
    %284 = vector.extract_strided_slice %258 {offsets = [0, 40], sizes = [2, 8], strides = [1, 1]} : vector<2x64xf32> to vector<2x8xf32>
    %285 = vector.broadcast %283 : vector<2x1xf32> to vector<2x8xf32>
    %286 = arith.mulf %285, %284 : vector<2x8xf32>
    %287 = arith.addf %282, %286 : vector<2x8xf32>
    %288 = vector.extract_strided_slice %256 {offsets = [0, 6], sizes = [2, 1], strides = [1, 1]} : vector<2x8xf32> to vector<2x1xf32>
    %289 = vector.extract_strided_slice %258 {offsets = [0, 48], sizes = [2, 8], strides = [1, 1]} : vector<2x64xf32> to vector<2x8xf32>
    %290 = vector.broadcast %288 : vector<2x1xf32> to vector<2x8xf32>
    %291 = arith.mulf %290, %289 : vector<2x8xf32>
    %292 = arith.addf %287, %291 : vector<2x8xf32>
    %293 = vector.extract_strided_slice %256 {offsets = [0, 7], sizes = [2, 1], strides = [1, 1]} : vector<2x8xf32> to vector<2x1xf32>
    %294 = vector.extract_strided_slice %258 {offsets = [0, 56], sizes = [2, 8], strides = [1, 1]} : vector<2x64xf32> to vector<2x8xf32>
    %295 = vector.broadcast %293 : vector<2x1xf32> to vector<2x8xf32>
    %296 = arith.mulf %295, %294 : vector<2x8xf32>
    %297 = arith.addf %292, %296 : vector<2x8xf32>
    %c0_13 = arith.constant 0 : index
    %c48 = arith.constant 48 : index
    %298 = vector.load %arg3[%c0_13, %c48] : memref<2x64xf32, #tpu.memory_space<vmem>>, vector<2x8xf32>
    tpu.vector_store %arg3[%c0_13, %c48], %297 {strides = array<i32>} : memref<2x64xf32, #tpu.memory_space<vmem>>, vector<2x8xf32>,
    %299 = vector.extract_strided_slice %10 {offsets = [14, 0], sizes = [2, 64], strides = [1, 1]} : vector<16x64xf32> to vector<2x64xf32>
    %300 = vector.extract_strided_slice %297 {offsets = [0, 0], sizes = [2, 1], strides = [1, 1]} : vector<2x8xf32> to vector<2x1xf32>
    %301 = vector.extract_strided_slice %299 {offsets = [0, 0], sizes = [2, 8], strides = [1, 1]} : vector<2x64xf32> to vector<2x8xf32>
    %302 = vector.broadcast %300 : vector<2x1xf32> to vector<2x8xf32>
    %303 = arith.mulf %302, %301 : vector<2x8xf32>
    %304 = vector.extract_strided_slice %297 {offsets = [0, 1], sizes = [2, 1], strides = [1, 1]} : vector<2x8xf32> to vector<2x1xf32>
    %305 = vector.extract_strided_slice %299 {offsets = [0, 8], sizes = [2, 8], strides = [1, 1]} : vector<2x64xf32> to vector<2x8xf32>
    %306 = vector.broadcast %304 : vector<2x1xf32> to vector<2x8xf32>
    %307 = arith.mulf %306, %305 : vector<2x8xf32>
    %308 = arith.addf %303, %307 : vector<2x8xf32>
    %309 = vector.extract_strided_slice %297 {offsets = [0, 2], sizes = [2, 1], strides = [1, 1]} : vector<2x8xf32> to vector<2x1xf32>
    %310 = vector.extract_strided_slice %299 {offsets = [0, 16], sizes = [2, 8], strides = [1, 1]} : vector<2x64xf32> to vector<2x8xf32>
    %311 = vector.broadcast %309 : vector<2x1xf32> to vector<2x8xf32>
    %312 = arith.mulf %311, %310 : vector<2x8xf32>
    %313 = arith.addf %308, %312 : vector<2x8xf32>
    %314 = vector.extract_strided_slice %297 {offsets = [0, 3], sizes = [2, 1], strides = [1, 1]} : vector<2x8xf32> to vector<2x1xf32>
    %315 = vector.extract_strided_slice %299 {offsets = [0, 24], sizes = [2, 8], strides = [1, 1]} : vector<2x64xf32> to vector<2x8xf32>
    %316 = vector.broadcast %314 : vector<2x1xf32> to vector<2x8xf32>
    %317 = arith.mulf %316, %315 : vector<2x8xf32>
    %318 = arith.addf %313, %317 : vector<2x8xf32>
    %319 = vector.extract_strided_slice %297 {offsets = [0, 4], sizes = [2, 1], strides = [1, 1]} : vector<2x8xf32> to vector<2x1xf32>
    %320 = vector.extract_strided_slice %299 {offsets = [0, 32], sizes = [2, 8], strides = [1, 1]} : vector<2x64xf32> to vector<2x8xf32>
    %321 = vector.broadcast %319 : vector<2x1xf32> to vector<2x8xf32>
    %322 = arith.mulf %321, %320 : vector<2x8xf32>
    %323 = arith.addf %318, %322 : vector<2x8xf32>
    %324 = vector.extract_strided_slice %297 {offsets = [0, 5], sizes = [2, 1], strides = [1, 1]} : vector<2x8xf32> to vector<2x1xf32>
    %325 = vector.extract_strided_slice %299 {offsets = [0, 40], sizes = [2, 8], strides = [1, 1]} : vector<2x64xf32> to vector<2x8xf32>
    %326 = vector.broadcast %324 : vector<2x1xf32> to vector<2x8xf32>
    %327 = arith.mulf %326, %325 : vector<2x8xf32>
    %328 = arith.addf %323, %327 : vector<2x8xf32>
    %329 = vector.extract_strided_slice %297 {offsets = [0, 6], sizes = [2, 1], strides = [1, 1]} : vector<2x8xf32> to vector<2x1xf32>
    %330 = vector.extract_strided_slice %299 {offsets = [0, 48], sizes = [2, 8], strides = [1, 1]} : vector<2x64xf32> to vector<2x8xf32>
    %331 = vector.broadcast %329 : vector<2x1xf32> to vector<2x8xf32>
    %332 = arith.mulf %331, %330 : vector<2x8xf32>
    %333 = arith.addf %328, %332 : vector<2x8xf32>
    %334 = vector.extract_strided_slice %297 {offsets = [0, 7], sizes = [2, 1], strides = [1, 1]} : vector<2x8xf32> to vector<2x1xf32>
    %335 = vector.extract_strided_slice %299 {offsets = [0, 56], sizes = [2, 8], strides = [1, 1]} : vector<2x64xf32> to vector<2x8xf32>
    %336 = vector.broadcast %334 : vector<2x1xf32> to vector<2x8xf32>
    %337 = arith.mulf %336, %335 : vector<2x8xf32>
    %338 = arith.addf %333, %337 : vector<2x8xf32>
    %c0_14 = arith.constant 0 : index
    %c56 = arith.constant 56 : index
    %339 = vector.load %arg3[%c0_14, %c56] : memref<2x64xf32, #tpu.memory_space<vmem>>, vector<2x8xf32>
    tpu.vector_store %arg3[%c0_14, %c56], %338 {strides = array<i32>} : memref<2x64xf32, #tpu.memory_space<vmem>>, vector<2x8xf32>,
    %c0_15 = arith.constant 0 : index
    %c0_16 = arith.constant 0 : index
    %340 = vector.load %arg4[%c0_15, %c0_16] : memref<2x8xf32, #tpu.memory_space<vmem>>, vector<2x8xf32>
    tpu.vector_store %arg4[%c0_15, %c0_16], %338 {strides = array<i32>} : memref<2x8xf32, #tpu.memory_space<vmem>>, vector<2x8xf32>,
    return
  }
  func.func @transform_0(%arg0: i32) -> (i32, i32) {
    %c0_i32 = arith.constant 0 : i32
    %c0_i32_0 = arith.constant 0 : i32
    return %arg0, %c0_i32 : i32, i32
  }
  func.func @transform_1(%arg0: i32) -> (i32, i32) {
    %c0_i32 = arith.constant 0 : i32
    %c0_i32_0 = arith.constant 0 : i32
    %c0_i32_1 = arith.constant 0 : i32
    return %c0_i32, %c0_i32_0 : i32, i32
  }
  func.func @transform_2(%arg0: i32) -> (i32, i32) {
    %c0_i32 = arith.constant 0 : i32
    %c0_i32_0 = arith.constant 0 : i32
    return %c0_i32, %arg0 : i32, i32
  }
}

</mosaic_0001>

<bundles_post_ra>
// kernel: tpu_custom_call.1
= control target key start
LH: loop header
LB: loop body
LE: loop exit
PB: predicated region body
PF: predicated region fallthrough
CT: control target
= control target key end

     0   :  { %v16_v1 = vlaneseq  ;;  %s1198_s0 = inlined_call_operand.vmem [shape: s32[16,1], index: 0, kind: input, shape index: {}]   ;;  %s1199_s1 = inlined_call_operand.vmem [shape: f32[16,64], index: 1, kind: input, shape index: {}]   ;;  %s1200_s2 = inlined_call_operand.hbm [shape: f32[2,64], index: 2, kind: output, shape index: {}]  }
   0x1   :  { %v23_v0 = vld [vmem:[%s1198_s0] sm:$0xff] }
   0x2   :  { %7 = vsyncpa [#allocation4], 0  ;;  %v890_v2 = vmov 0   ;;  %v39_v3 = vld [vmem:[%s1199_s1] sm:$0xff]  ;;  %v40_v4 = vld [vmem:[%s1199_s1 + $0x8] sm:$0xff]  ;;  %v17_v6 = vand.u32 127, %v16_v1 }
   0x3   :  { %801 = vset.pattern.permute.xlu0 %v890_v2  ;;  %v773_v5 = vpack.c.bf16 %v40_v4, %v39_v3  ;;  %v24_v7 = vld [vmem:[%s1198_s0 + $0x8] sm:$0xff]  ;;  %vm21_vm0 = vcmask 58368   ;;  %v891_v8 = vmov 0.0   ;;  %v892_v10 = vmov 1   ;;  %s899_s0 = smov 120   ;;  %s900_s1 = smov 112  }
   0x4   :  { %28 = vperm.xlu0 %801, %v23_v0   ;;  %vm18_vm1 = vcmp.eq.s32.totalorder %v17_v6, 0  ;;  %802 = vset.pattern.permute.xlu1 %v892_v10  ;;  %v893_v11 = vmov 3   ;;  %v894_v13 = vmov 2   ;;  %v895_v14 = vmov 6   ;;  %s901_s17 = smov 104   ;;  %s902_s18 = smov 96  }
   0x5   :  { %774 = vmatprep.subr.bf16.mxu0 %v773_v5  ;;  %v757_v9 = vsel %vm18_vm1, 1.0, %v891_v8  ;;  %v896_v15 = vmov 4   ;;  %v897_v16 = vmov 5   ;;  %v898_v17 = vmov 7   ;;  %s903_s19 = smov 80   ;;  %s904_s20 = smov 88  }
   0x6   :  { %776 = vmatpush3.bf16.msra.mxu0 %v773_v5  ;;  %22 = vst.msk [vmem:[#allocation2] sm:$0x3] %vm21_vm0, %v757_v9  ;;  %vm41_vm2 = vcmask 130048   ;;  %s905_s21 = smov 72   ;;  %s906_s22 = smov 8   ;;  %vm278_vm5 = vcmask 123968  }
   0x7   :  { %s907_s23 = smov 24   ;;  %s908_s24 = smov 40   ;;  %vm354_vm6 = vcmask 189568   ;;  %vm430_vm7 = vcmask 255168   ;;  %vm511_vm8 = vcmask 320768   ;;  %vm588_vm9 = vcmask 386368  }
   0x8   :  { %31 = vperm.xlu0 %801, %v24_v7   ;;  %s909_s25 = smov 16   ;;  %s910_s26 = smov 32   ;;  %vm664_vm10 = vcmask 451968   ;;  %vm740_vm11 = vcmask 517568  }
   0x9   :  { %s911_s27 = smov 48   ;;  %s912_s28 = smov 56  }
   0xa   :  { %s913_s29 = smov [#allocation3]  }
   0xb   :  { %s749_s30 = sshll.u32 %s913_s29, 4  ;;  %s750_s30 = int_to_ptr.vmem [resolvable:$true] %s749_s30 }
   0xc   :  { %804 = vset.pattern.permute.xlu0 %v893_v11  ;;  %s866_s3 = scalar_lea.vmem %s750_s30, 32  ;;  %p871_p1 = scmp.lt.s32.totalorder %s750_s30, %s750_s30 }
   0xd   :  { %v123_v12 = vld [vmem:[#allocation2] sm:$0x3]  ;;  %p867_p0 = scmp.ne.s32.totalorder %s750_s30, %s866_s3  ;;  %p872_p2 = scmp.lt.s32.totalorder %s866_s3, %s866_s3 }
   0xe   :  { %131 = vperm.xlu1 %802, %v123_v12   ;;  %151 = vperm.xlu0 %804, %v123_v12  }
   0xf   :  { %p873_p3 = por %p872_p2, %p871_p1 }
  0x11   :  { %p874_p4 = pnand %p873_p3, %p867_p0 }
  0x12   :  { %803 = vset.pattern.permute.xlu1 %v894_v13  ;;  %807 = vset.pattern.permute.xlu0 %v895_v14 }
  0x13   :  { %141 = vperm.xlu1 %803, %v123_v12   ;;  %181 = vperm.xlu0 %807, %v123_v12  }
  0x17   :  { %805 = vset.pattern.permute.xlu1 %v896_v15  ;;  %810 = vset.pattern.permute.xlu0 %v892_v10 }
  0x18   :  { %161 = vperm.xlu1 %805, %v123_v12  }
  0x1c   :  { %806 = vset.pattern.permute.xlu1 %v897_v16 }
  0x1d   :  { %171 = vperm.xlu1 %806, %v123_v12  }
  0x21   :  { %808 = vset.pattern.permute.xlu1 %v898_v17 }
  0x22   :  { %191 = vperm.xlu1 %808, %v123_v12  }
  0x26   :  { %809 = vset.pattern.permute.xlu1 %v890_v2 }
  0x27   :  { %126 = vperm.xlu1 %809, %v123_v12  }
  0x83   :  { %v29_v18 = vpop.permute.xlu0 %28 }
  0x84   :  { %vm33_vm3 = vcmp.eq.s32.totalorder %v29_v18, %v17_v6 }
  0x85   :  { %v758_v19 = vsel %vm33_vm3, 1.0, %v891_v8 }
  0x86   :  { %770 = vmatprep.mubr.msk.f32.mxu0 %vm41_vm2, %v758_v19 }
  0x87   :  { %v32_v20 = vpop.permute.xlu0 %31 }
  0x88   :  { %vm34_vm4 = vcmp.eq.s32.totalorder %v32_v20, %v17_v6 }
  0x89   :  { %v759_v21 = vsel %vm34_vm4, 1.0, %v891_v8 }
  0x8a   :  { %771 = vmatmul.mubr.msk.f32.vlgmr.msra.gmra.mrb[0].mxu0 %vm41_vm2, %v759_v21 }
  0x8d   :  { %v132_v22 = vpop.permute.xlu1 %131  ;;  %v152_v27 = vpop.permute.xlu0 %151 }
  0x92   :  { %v142_v23 = vpop.permute.xlu1 %141  ;;  %v182_v33 = vpop.permute.xlu0 %181 }
  0x97   :  { %v162_v26 = vpop.permute.xlu1 %161 }
  0x9c   :  { %v172_v32 = vpop.permute.xlu1 %171 }
  0xa1   :  { %v192_v36 = vpop.permute.xlu1 %191 }
  0xa6   :  { %v127_v39 = vpop.permute.xlu1 %126 }
 0x15d   :  { %v952_v24 = vpop.f32.mrb[0].mxu0 }
 0x15e   :  { %v954_v25 = vpop.f32.mrb[1].mxu0 }
 0x15f   :  { %v134_v28 = vmul.f32 %v132_v22, %v954_v25  ;;  %v144_v29 = vmul.f32 %v142_v23, %v954_v25  ;;  %v154_v30 = vmul.f32 %v152_v27, %v954_v25  ;;  %v164_v31 = vmul.f32 %v162_v26, %v954_v25 }
 0x160   :  { %v184_v34 = vmul.f32 %v182_v33, %v954_v25  ;;  %v174_v35 = vmul.f32 %v172_v32, %v954_v25  ;;  %v208_v37 = vrot.slane %v954_v25, 2  ;;  %v194_v38 = vmul.f32 %v192_v36, %v954_v25 }
 0x161   :  { %136 = vrot.lane.b32.xlu0 %v134_v28, %s899_s0  ;;  %146 = vrot.lane.b32.xlu1 %v144_v29, %s900_s1  ;;  %v129_v40 = vmul.f32 %v127_v39, %v954_v25  ;;  %v984_v55 = vrot.slane %v954_v25, 4  ;;  %v1018_v32 = vrot.slane %v954_v25, 6 }
 0x165   :  { %156 = vrot.lane.b32.xlu0 %v154_v30, %s901_s17  ;;  %166 = vrot.lane.b32.xlu1 %v164_v31, %s902_s18 }
 0x169   :  { %186 = vrot.lane.b32.xlu1 %v184_v34, %s903_s19  ;;  %176 = vrot.lane.b32.xlu0 %v174_v35, %s904_s20 }
 0x16d   :  { %215 = vrot.lane.b32.xlu1 %v208_v37, %s899_s0  ;;  %196 = vrot.lane.b32.xlu0 %v194_v38, %s905_s21 }
 0x171   :  { %224 = vrot.lane.b32.xlu0 %v208_v37, %s900_s1 }
 0x175   :  { %233 = vrot.lane.b32.xlu0 %v208_v37, %s901_s17 }
 0x1d3   :  { %v137_v41 = vpop.permute.xlu0 %136  ;;  %v147_v42 = vpop.permute.xlu1 %146 }
 0x1d4   :  { %v139_v43 = vadd.f32 %v137_v41, %v129_v40 }
 0x1d6   :  { %v149_v44 = vadd.f32 %v147_v42, %v139_v43 }
 0x1d7   :  { %v157_v45 = vpop.permute.xlu0 %156  ;;  %v167_v46 = vpop.permute.xlu1 %166 }
 0x1d8   :  { %v159_v47 = vadd.f32 %v157_v45, %v149_v44 }
 0x1da   :  { %v169_v48 = vadd.f32 %v167_v46, %v159_v47 }
 0x1db   :  { %v177_v49 = vpop.permute.xlu0 %176  ;;  %v187_v51 = vpop.permute.xlu1 %186 }
 0x1dc   :  { %v179_v50 = vadd.f32 %v177_v49, %v169_v48 }
 0x1de   :  { %v189_v52 = vadd.f32 %v187_v51, %v179_v50 }
 0x1df   :  { %v197_v53 = vpop.permute.xlu0 %196  ;;  %v216_v56 = vpop.permute.xlu1 %215 }
 0x1e0   :  { %v199_v54 = vadd.f32 %v197_v53, %v189_v52 }
 0x1e2   :  { %201 = vst.msk [vmem:[#allocation3] sm:$0x3] %vm21_vm0, %v199_v54  ;;  %212 = vperm.xlu0 %810, %v199_v54   ;;  %204 = vperm.xlu1 %809, %v199_v54  }
 0x1e3   :  { %v225_v58 = vpop.permute.xlu0 %224 }
 0x1e6   :  { %813 = vset.pattern.permute.xlu0 %v896_v15  ;;  %811 = vset.pattern.permute.xlu1 %v894_v13 }
 0x1e7   :  { %239 = vperm.xlu0 %813, %v199_v54   ;;  %221 = vperm.xlu1 %811, %v199_v54   ;;  %v234_v60 = vpop.permute.xlu0 %233 }
 0x1eb   :  { %242 = vrot.lane.b32.xlu0 %v208_v37, %s902_s18  ;;  %812 = vset.pattern.permute.xlu1 %v893_v11 }
 0x1ec   :  { %230 = vperm.xlu1 %812, %v199_v54   ;;  %817 = vset.pattern.permute.xlu0 %v890_v2 }
 0x1ef   :  { %260 = vrot.lane.b32.xlu0 %v208_v37, %s903_s19 }
 0x1f0   :  { %814 = vset.pattern.permute.xlu1 %v897_v16 }
 0x1f1   :  { %248 = vperm.xlu1 %814, %v199_v54  }
 0x1f3   :  { %309 = vrot.lane.b32.xlu0 %v984_v55, %s901_s17 }
 0x1f5   :  { %815 = vset.pattern.permute.xlu1 %v895_v14 }
 0x1f6   :  { %257 = vperm.xlu1 %815, %v199_v54  }
 0x1fa   :  { %816 = vset.pattern.permute.xlu1 %v898_v17 }
 0x1fb   :  { %266 = vperm.xlu1 %816, %v199_v54  }
 0x1ff   :  { %251 = vrot.lane.b32.xlu1 %v208_v37, %s904_s20 }
 0x200   :  { %818 = vset.pattern.permute.xlu1 %v892_v10 }
 0x203   :  { %269 = vrot.lane.b32.xlu1 %v208_v37, %s905_s21 }
 0x207   :  { %291 = vrot.lane.b32.xlu1 %v984_v55, %s899_s0 }
 0x20b   :  { %300 = vrot.lane.b32.xlu1 %v984_v55, %s900_s1 }
 0x261   :  { %v205_v57 = vpop.permute.xlu1 %204  ;;  %v213_v62 = vpop.permute.xlu0 %212 }
 0x262   :  { %v218_v0 = vmul.f32 %v216_v56, %v213_v62  ;;  %v210_v1 = vmul.f32 %v208_v37, %v205_v57 }
 0x264   :  { %v219_v6 = vadd.f32 %v218_v0, %v210_v1 }
 0x266   :  { %v222_v59 = vpop.permute.xlu1 %221  ;;  %v240_v3 = vpop.permute.xlu0 %239 }
 0x267   :  { %v227_v4 = vmul.f32 %v225_v58, %v222_v59 }
 0x269   :  { %v228_v8 = vadd.f32 %v227_v4, %v219_v6 }
 0x26a   :  { %v243_v9 = vpop.permute.xlu0 %242 }
 0x26b   :  { %v231_v61 = vpop.permute.xlu1 %230  ;;  %v245_v19 = vmul.f32 %v243_v9, %v240_v3 }
 0x26c   :  { %v236_v7 = vmul.f32 %v234_v60, %v231_v61 }
 0x26e   :  { %v237_v18 = vadd.f32 %v236_v7, %v228_v8  ;;  %v261_v23 = vpop.permute.xlu0 %260 }
 0x270   :  { %v249_v63 = vpop.permute.xlu1 %248  ;;  %v246_v21 = vadd.f32 %v245_v19, %v237_v18 }
 0x272   :  { %v310_v33 = vpop.permute.xlu0 %309 }
 0x275   :  { %v258_v5 = vpop.permute.xlu1 %257 }
 0x276   :  { %v263_v26 = vmul.f32 %v261_v23, %v258_v5 }
 0x27a   :  { %v267_v12 = vpop.permute.xlu1 %266 }
 0x27e   :  { %v252_v20 = vpop.permute.xlu1 %251 }
 0x27f   :  { %v254_v22 = vmul.f32 %v252_v20, %v249_v63 }
 0x281   :  { %v255_v27 = vadd.f32 %v254_v22, %v246_v21 }
 0x282   :  { %v270_v28 = vpop.permute.xlu1 %269 }
 0x283   :  { %v264_v29 = vadd.f32 %v263_v26, %v255_v27  ;;  %v272_v30 = vmul.f32 %v270_v28, %v267_v12 }
 0x285   :  { %v997_v31 = vadd.f32 %v272_v30, %v264_v29 }
 0x286   :  { %v292_v25 = vpop.permute.xlu1 %291 }
 0x287   :  { %288 = vperm.xlu1 %818, %v997_v31   ;;  %281 = vperm.xlu0 %817, %v997_v31  }
 0x28a   :  { %v301_v34 = vpop.permute.xlu1 %300 }
 0x28b   :  { %819 = vset.pattern.permute.xlu1 %v894_v13  ;;  %820 = vset.pattern.permute.xlu0 %v893_v11 }
 0x28c   :  { %297 = vperm.xlu1 %819, %v997_v31   ;;  %306 = vperm.xlu0 %820, %v997_v31  }
 0x290   :  { %821 = vset.pattern.permute.xlu1 %v896_v15  ;;  %822 = vset.pattern.permute.xlu0 %v897_v16 }
 0x291   :  { %315 = vperm.xlu1 %821, %v997_v31   ;;  %324 = vperm.xlu0 %822, %v997_v31  }
 0x295   :  { %823 = vset.pattern.permute.xlu1 %v895_v14  ;;  %318 = vrot.lane.b32.xlu0 %v984_v55, %s902_s18 }
 0x296   :  { %333 = vperm.xlu1 %823, %v997_v31   ;;  %825 = vset.pattern.permute.xlu0 %v890_v2 }
 0x299   :  { %336 = vrot.lane.b32.xlu0 %v984_v55, %s903_s19 }
 0x29a   :  { %824 = vset.pattern.permute.xlu1 %v898_v17 }
 0x29b   :  { %342 = vperm.xlu1 %824, %v997_v31  }
 0x29d   :  { %385 = vrot.lane.b32.xlu0 %v1018_v32, %s901_s17 }
 0x29f   :  { %327 = vrot.lane.b32.xlu1 %v984_v55, %s904_s20 }
 0x2a0   :  { %826 = vset.pattern.permute.xlu1 %v892_v10 }
 0x2a3   :  { %345 = vrot.lane.b32.xlu1 %v984_v55, %s905_s21 }
 0x2a7   :  { %367 = vrot.lane.b32.xlu1 %v1018_v32, %s899_s0 }
 0x2ab   :  { %376 = vrot.lane.b32.xlu1 %v1018_v32, %s900_s1 }
 0x306   :  { %v282_v35 = vpop.permute.xlu0 %281  ;;  %v289_v36 = vpop.permute.xlu1 %288 }
 0x307   :  { %v286_v41 = vmul.f32 %v984_v55, %v282_v35  ;;  %v294_v42 = vmul.f32 %v292_v25, %v289_v36 }
 0x309   :  { %v295_v45 = vadd.f32 %v294_v42, %v286_v41 }
 0x30b   :  { %v298_v37 = vpop.permute.xlu1 %297  ;;  %v307_v38 = vpop.permute.xlu0 %306 }
 0x30c   :  { %v303_v43 = vmul.f32 %v301_v34, %v298_v37  ;;  %v312_v49 = vmul.f32 %v310_v33, %v307_v38 }
 0x30e   :  { %v304_v47 = vadd.f32 %v303_v43, %v295_v45 }
 0x310   :  { %v316_v39 = vpop.permute.xlu1 %315  ;;  %v325_v40 = vpop.permute.xlu0 %324  ;;  %v313_v51 = vadd.f32 %v312_v49, %v304_v47 }
 0x314   :  { %v319_v46 = vpop.permute.xlu0 %318 }
 0x315   :  { %v334_v44 = vpop.permute.xlu1 %333  ;;  %v321_v50 = vmul.f32 %v319_v46, %v316_v39 }
 0x317   :  { %v322_v54 = vadd.f32 %v321_v50, %v313_v51 }
 0x318   :  { %v337_v52 = vpop.permute.xlu0 %336 }
 0x319   :  { %v339_v57 = vmul.f32 %v337_v52, %v334_v44  ;;  %v518_v52 = vrot.slane %v952_v24, 2 }
 0x31a   :  { %v343_v48 = vpop.permute.xlu1 %342 }
 0x31c   :  { %v386_v63 = vpop.permute.xlu0 %385 }
 0x31e   :  { %v328_v53 = vpop.permute.xlu1 %327 }
 0x31f   :  { %v330_v56 = vmul.f32 %v328_v53, %v325_v40 }
 0x321   :  { %v331_v58 = vadd.f32 %v330_v56, %v322_v54 }
 0x322   :  { %v346_v59 = vpop.permute.xlu1 %345 }
 0x323   :  { %v340_v60 = vadd.f32 %v339_v57, %v331_v58  ;;  %v348_v61 = vmul.f32 %v346_v59, %v343_v48 }
 0x325   :  { %v1033_v55 = vadd.f32 %v348_v61, %v340_v60 }
 0x326   :  { %v368_v62 = vpop.permute.xlu1 %367 }
 0x327   :  { %364 = vperm.xlu1 %826, %v1033_v55   ;;  %357 = vperm.xlu0 %825, %v1033_v55  }
 0x32a   :  { %v377_v0 = vpop.permute.xlu1 %376 }
 0x32b   :  { %827 = vset.pattern.permute.xlu1 %v894_v13  ;;  %828 = vset.pattern.permute.xlu0 %v893_v11 }
 0x32c   :  { %373 = vperm.xlu1 %827, %v1033_v55   ;;  %382 = vperm.xlu0 %828, %v1033_v55  }
 0x330   :  { %829 = vset.pattern.permute.xlu1 %v896_v15  ;;  %830 = vset.pattern.permute.xlu0 %v897_v16 }
 0x331   :  { %391 = vperm.xlu1 %829, %v1033_v55   ;;  %400 = vperm.xlu0 %830, %v1033_v55  }
 0x335   :  { %831 = vset.pattern.permute.xlu1 %v895_v14  ;;  %394 = vrot.lane.b32.xlu0 %v1018_v32, %s902_s18 }
 0x336   :  { %409 = vperm.xlu1 %831, %v1033_v55   ;;  %833 = vset.pattern.permute.xlu0 %v892_v10 }
 0x339   :  { %412 = vrot.lane.b32.xlu0 %v1018_v32, %s903_s19 }
 0x33a   :  { %832 = vset.pattern.permute.xlu1 %v898_v17 }
 0x33b   :  { %418 = vperm.xlu1 %832, %v1033_v55  }
 0x33f   :  { %403 = vrot.lane.b32.xlu1 %v1018_v32, %s904_s20 }
 0x340   :  { %834 = vset.pattern.permute.xlu1 %v894_v13 }
 0x343   :  { %421 = vrot.lane.b32.xlu1 %v1018_v32, %s905_s21 }
 0x3a6   :  { %v358_v1 = vpop.permute.xlu0 %357  ;;  %v365_v3 = vpop.permute.xlu1 %364 }
 0x3a7   :  { %v362_v8 = vmul.f32 %v1018_v32, %v358_v1  ;;  %v370_v9 = vmul.f32 %v368_v62, %v365_v3 }
 0x3a9   :  { %v371_v19 = vadd.f32 %v370_v9, %v362_v8 }
 0x3ab   :  { %v374_v4 = vpop.permute.xlu1 %373  ;;  %v383_v5 = vpop.permute.xlu0 %382 }
 0x3ac   :  { %v379_v12 = vmul.f32 %v377_v0, %v374_v4  ;;  %v388_v23 = vmul.f32 %v386_v63, %v383_v5 }
 0x3ae   :  { %v380_v21 = vadd.f32 %v379_v12, %v371_v19 }
 0x3b0   :  { %v392_v6 = vpop.permute.xlu1 %391  ;;  %v401_v7 = vpop.permute.xlu0 %400  ;;  %v389_v27 = vadd.f32 %v388_v23, %v380_v21 }
 0x3b4   :  { %v395_v20 = vpop.permute.xlu0 %394 }
 0x3b5   :  { %v410_v18 = vpop.permute.xlu1 %409  ;;  %v397_v26 = vmul.f32 %v395_v20, %v392_v6 }
 0x3b7   :  { %v398_v30 = vadd.f32 %v397_v26, %v389_v27 }
 0x3b8   :  { %v413_v28 = vpop.permute.xlu0 %412 }
 0x3b9   :  { %v415_v33 = vmul.f32 %v413_v28, %v410_v18 }
 0x3ba   :  { %v419_v22 = vpop.permute.xlu1 %418 }
 0x3be   :  { %v404_v29 = vpop.permute.xlu1 %403 }
 0x3bf   :  { %v406_v25 = vmul.f32 %v404_v29, %v401_v7  ;;  %v1117_v7 = vrot.slane %v952_v24, 4 }
 0x3c1   :  { %v407_v34 = vadd.f32 %v406_v25, %v398_v30 }
 0x3c2   :  { %v422_v35 = vpop.permute.xlu1 %421 }
 0x3c3   :  { %v416_v36 = vadd.f32 %v415_v33, %v407_v34  ;;  %v424_v37 = vmul.f32 %v422_v35, %v419_v22 }
 0x3c5   :  { %v1060_v32 = vadd.f32 %v424_v37, %v416_v36 }
 0x3c7   :  { %448 = vperm.xlu1 %834, %v1060_v32   ;;  %438 = vperm.xlu0 %833, %v1060_v32  }
 0x3cb   :  { %835 = vset.pattern.permute.xlu1 %v893_v11  ;;  %836 = vset.pattern.permute.xlu0 %v896_v15 }
 0x3cc   :  { %458 = vperm.xlu1 %835, %v1060_v32   ;;  %468 = vperm.xlu0 %836, %v1060_v32  }
 0x3d0   :  { %837 = vset.pattern.permute.xlu1 %v897_v16  ;;  %839 = vset.pattern.permute.xlu0 %v898_v17 }
 0x3d1   :  { %478 = vperm.xlu1 %837, %v1060_v32   ;;  %498 = vperm.xlu0 %839, %v1060_v32  }
 0x3d5   :  { %838 = vset.pattern.permute.xlu1 %v895_v14  ;;  %841 = vset.pattern.permute.xlu0 %v890_v2 }
 0x3d6   :  { %488 = vperm.xlu1 %838, %v1060_v32  }
 0x3da   :  { %840 = vset.pattern.permute.xlu1 %v890_v2 }
 0x3db   :  { %433 = vperm.xlu1 %840, %v1060_v32  }
 0x3df   :  { %842 = vset.pattern.permute.xlu1 %v892_v10 }
 0x446   :  { %v449_v38 = vpop.permute.xlu1 %448  ;;  %v439_v39 = vpop.permute.xlu0 %438 }
 0x447   :  { %v451_v40 = vmul.f32 %v952_v24, %v449_v38  ;;  %v441_v41 = vmul.f32 %v952_v24, %v439_v39 }
 0x449   :  { %453 = vrot.lane.b32.xlu0 %v451_v40, %s900_s1  ;;  %443 = vrot.lane.b32.xlu1 %v441_v41, %s899_s0 }
 0x44b   :  { %v459_v42 = vpop.permute.xlu1 %458  ;;  %v469_v43 = vpop.permute.xlu0 %468 }
 0x44c   :  { %v461_v44 = vmul.f32 %v952_v24, %v459_v42  ;;  %v471_v45 = vmul.f32 %v952_v24, %v469_v43 }
 0x44e   :  { %463 = vrot.lane.b32.xlu1 %v461_v44, %s901_s17  ;;  %473 = vrot.lane.b32.xlu0 %v471_v45, %s902_s18 }
 0x450   :  { %v479_v46 = vpop.permute.xlu1 %478  ;;  %v499_v48 = vpop.permute.xlu0 %498 }
 0x451   :  { %v481_v47 = vmul.f32 %v952_v24, %v479_v46  ;;  %v501_v49 = vmul.f32 %v952_v24, %v499_v48  ;;  %v1150_v48 = vrot.slane %v952_v24, 6 }
 0x453   :  { %483 = vrot.lane.b32.xlu1 %v481_v47, %s904_s20 }
 0x455   :  { %v489_v50 = vpop.permute.xlu1 %488 }
 0x456   :  { %v491_v51 = vmul.f32 %v952_v24, %v489_v50 }
 0x457   :  { %503 = vrot.lane.b32.xlu1 %v501_v49, %s905_s21 }
 0x458   :  { %493 = vrot.lane.b32.xlu0 %v491_v51, %s903_s19 }
 0x45a   :  { %v434_v53 = vpop.permute.xlu1 %433 }
 0x45b   :  { %525 = vrot.lane.b32.xlu1 %v518_v52, %s899_s0  ;;  %v436_v54 = vmul.f32 %v952_v24, %v434_v53 }
 0x45c   :  { %543 = vrot.lane.b32.xlu0 %v518_v52, %s901_s17 }
 0x45f   :  { %534 = vrot.lane.b32.xlu1 %v518_v52, %s900_s1 }
 0x4bb   :  { %v444_v56 = vpop.permute.xlu1 %443  ;;  %v454_v58 = vpop.permute.xlu0 %453 }
 0x4bc   :  { %v446_v57 = vadd.f32 %v444_v56, %v436_v54 }
 0x4be   :  { %v456_v59 = vadd.f32 %v454_v58, %v446_v57 }
 0x4c0   :  { %v464_v60 = vpop.permute.xlu1 %463  ;;  %v474_v62 = vpop.permute.xlu0 %473 }
 0x4c1   :  { %v466_v61 = vadd.f32 %v464_v60, %v456_v59 }
 0x4c3   :  { %v476_v63 = vadd.f32 %v474_v62, %v466_v61 }
 0x4c5   :  { %v484_v0 = vpop.permute.xlu1 %483 }
 0x4c6   :  { %v486_v1 = vadd.f32 %v484_v0, %v476_v63 }
 0x4c9   :  { %v504_v5 = vpop.permute.xlu1 %503 }
 0x4ca   :  { %v494_v3 = vpop.permute.xlu0 %493 }
 0x4cb   :  { %v496_v4 = vadd.f32 %v494_v3, %v486_v1 }
 0x4cd   :  { %v1097_v6 = vadd.f32 %v504_v5, %v496_v4  ;;  %v526_v8 = vpop.permute.xlu1 %525 }
 0x4ce   :  { %v544_v9 = vpop.permute.xlu0 %543 }
 0x4cf   :  { %522 = vperm.xlu1 %842, %v1097_v6   ;;  %514 = vperm.xlu0 %841, %v1097_v6  }
 0x4d1   :  { %v535_v12 = vpop.permute.xlu1 %534 }
 0x4d3   :  { %843 = vset.pattern.permute.xlu1 %v894_v13  ;;  %844 = vset.pattern.permute.xlu0 %v893_v11 }
 0x4d4   :  { %531 = vperm.xlu1 %843, %v1097_v6   ;;  %540 = vperm.xlu0 %844, %v1097_v6  }
 0x4d8   :  { %845 = vset.pattern.permute.xlu1 %v896_v15  ;;  %846 = vset.pattern.permute.xlu0 %v897_v16 }
 0x4d9   :  { %549 = vperm.xlu1 %845, %v1097_v6   ;;  %558 = vperm.xlu0 %846, %v1097_v6  }
 0x4dd   :  { %847 = vset.pattern.permute.xlu1 %v895_v14  ;;  %552 = vrot.lane.b32.xlu0 %v518_v52, %s902_s18 }
 0x4de   :  { %567 = vperm.xlu1 %847, %v1097_v6   ;;  %849 = vset.pattern.permute.xlu0 %v890_v2 }
 0x4e1   :  { %570 = vrot.lane.b32.xlu0 %v518_v52, %s903_s19 }
 0x4e2   :  { %848 = vset.pattern.permute.xlu1 %v898_v17 }
 0x4e3   :  { %576 = vperm.xlu1 %848, %v1097_v6  }
 0x4e5   :  { %619 = vrot.lane.b32.xlu0 %v1117_v7, %s901_s17 }
 0x4e7   :  { %561 = vrot.lane.b32.xlu1 %v518_v52, %s904_s20 }
 0x4e8   :  { %850 = vset.pattern.permute.xlu1 %v892_v10 }
 0x4eb   :  { %579 = vrot.lane.b32.xlu1 %v518_v52, %s905_s21 }
 0x4ef   :  { %601 = vrot.lane.b32.xlu1 %v1117_v7, %s899_s0 }
 0x4f3   :  { %610 = vrot.lane.b32.xlu1 %v1117_v7, %s900_s1 }
 0x54e   :  { %v523_v18 = vpop.permute.xlu1 %522  ;;  %v515_v19 = vpop.permute.xlu0 %514 }
 0x54f   :  { %v528_v26 = vmul.f32 %v526_v8, %v523_v18  ;;  %v520_v27 = vmul.f32 %v518_v52, %v515_v19 }
 0x551   :  { %v529_v30 = vadd.f32 %v528_v26, %v520_v27 }
 0x553   :  { %v532_v20 = vpop.permute.xlu1 %531  ;;  %v541_v21 = vpop.permute.xlu0 %540 }
 0x554   :  { %v537_v28 = vmul.f32 %v535_v12, %v532_v20  ;;  %v546_v35 = vmul.f32 %v544_v9, %v541_v21 }
 0x556   :  { %v538_v33 = vadd.f32 %v537_v28, %v529_v30 }
 0x558   :  { %v550_v22 = vpop.permute.xlu1 %549  ;;  %v559_v23 = vpop.permute.xlu0 %558  ;;  %v547_v37 = vadd.f32 %v546_v35, %v538_v33 }
 0x55c   :  { %v553_v25 = vpop.permute.xlu0 %552 }
 0x55d   :  { %v568_v29 = vpop.permute.xlu1 %567  ;;  %v555_v36 = vmul.f32 %v553_v25, %v550_v22 }
 0x55f   :  { %v556_v40 = vadd.f32 %v555_v36, %v547_v37 }
 0x560   :  { %v571_v38 = vpop.permute.xlu0 %570 }
 0x561   :  { %v573_v42 = vmul.f32 %v571_v38, %v568_v29 }
 0x562   :  { %v577_v34 = vpop.permute.xlu1 %576 }
 0x564   :  { %v620_v24 = vpop.permute.xlu0 %619 }
 0x566   :  { %v562_v39 = vpop.permute.xlu1 %561 }
 0x567   :  { %v564_v41 = vmul.f32 %v562_v39, %v559_v23 }
 0x569   :  { %v565_v43 = vadd.f32 %v564_v41, %v556_v40 }
 0x56a   :  { %v580_v44 = vpop.permute.xlu1 %579 }
 0x56b   :  { %v574_v45 = vadd.f32 %v573_v42, %v565_v43  ;;  %v582_v46 = vmul.f32 %v580_v44, %v577_v34 }
 0x56d   :  { %v1128_v47 = vadd.f32 %v582_v46, %v574_v45 }
 0x56f   :  { %598 = vperm.xlu1 %850, %v1128_v47   ;;  %591 = vperm.xlu0 %849, %v1128_v47  }
 0x573   :  { %851 = vset.pattern.permute.xlu1 %v894_v13  ;;  %852 = vset.pattern.permute.xlu0 %v893_v11 }
 0x574   :  { %607 = vperm.xlu1 %851, %v1128_v47   ;;  %616 = vperm.xlu0 %852, %v1128_v47  }
 0x578   :  { %853 = vset.pattern.permute.xlu1 %v896_v15  ;;  %854 = vset.pattern.permute.xlu0 %v897_v16 }
 0x579   :  { %625 = vperm.xlu1 %853, %v1128_v47   ;;  %634 = vperm.xlu0 %854, %v1128_v47  }
 0x57d   :  { %855 = vset.pattern.permute.xlu1 %v895_v14  ;;  %628 = vrot.lane.b32.xlu0 %v1117_v7, %s902_s18 }
 0x57e   :  { %643 = vperm.xlu1 %855, %v1128_v47   ;;  %857 = vset.pattern.permute.xlu0 %v890_v2  ;;  %v602_v2 = vpop.permute.xlu1 %601 }
 0x581   :  { %646 = vrot.lane.b32.xlu0 %v1117_v7, %s903_s19 }
 0x582   :  { %856 = vset.pattern.permute.xlu1 %v898_v17  ;;  %v611_v49 = vpop.permute.xlu1 %610 }
 0x583   :  { %652 = vperm.xlu1 %856, %v1128_v47  }
 0x585   :  { %695 = vrot.lane.b32.xlu0 %v1150_v48, %s901_s17 }
 0x587   :  { %637 = vrot.lane.b32.xlu1 %v1117_v7, %s904_s20 }
 0x588   :  { %858 = vset.pattern.permute.xlu1 %v892_v10 }
 0x58b   :  { %655 = vrot.lane.b32.xlu1 %v1117_v7, %s905_s21 }
 0x58f   :  { %677 = vrot.lane.b32.xlu1 %v1150_v48, %s899_s0 }
 0x593   :  { %686 = vrot.lane.b32.xlu1 %v1150_v48, %s900_s1 }
 0x5ee   :  { %v599_v50 = vpop.permute.xlu1 %598  ;;  %v592_v51 = vpop.permute.xlu0 %591 }
 0x5ef   :  { %v604_v57 = vmul.f32 %v602_v2, %v599_v50  ;;  %v596_v10 = vmul.f32 %v1117_v7, %v592_v51 }
 0x5f1   :  { %v605_v60 = vadd.f32 %v604_v57, %v596_v10 }
 0x5f3   :  { %v608_v52 = vpop.permute.xlu1 %607  ;;  %v617_v53 = vpop.permute.xlu0 %616 }
 0x5f4   :  { %v613_v58 = vmul.f32 %v611_v49, %v608_v52  ;;  %v622_v0 = vmul.f32 %v620_v24, %v617_v53 }
 0x5f6   :  { %v614_v62 = vadd.f32 %v613_v58, %v605_v60 }
 0x5f8   :  { %v626_v54 = vpop.permute.xlu1 %625  ;;  %v635_v56 = vpop.permute.xlu0 %634  ;;  %v623_v3 = vadd.f32 %v622_v0, %v614_v62 }
 0x5fc   :  { %v629_v61 = vpop.permute.xlu0 %628 }
 0x5fd   :  { %v644_v59 = vpop.permute.xlu1 %643  ;;  %v631_v1 = vmul.f32 %v629_v61, %v626_v54 }
 0x5ff   :  { %v632_v8 = vadd.f32 %v631_v1, %v623_v3 }
 0x600   :  { %v647_v4 = vpop.permute.xlu0 %646 }
 0x601   :  { %v649_v12 = vmul.f32 %v647_v4, %v644_v59 }
 0x602   :  { %v653_v63 = vpop.permute.xlu1 %652 }
 0x606   :  { %v638_v5 = vpop.permute.xlu1 %637 }
 0x607   :  { %v640_v9 = vmul.f32 %v638_v5, %v635_v56 }
 0x609   :  { %v641_v18 = vadd.f32 %v640_v9, %v632_v8 }
 0x60a   :  { %v656_v19 = vpop.permute.xlu1 %655 }
 0x60b   :  { %v650_v20 = vadd.f32 %v649_v12, %v641_v18  ;;  %v658_v21 = vmul.f32 %v656_v19, %v653_v63 }
 0x60d   :  { %v659_v22 = vadd.f32 %v658_v21, %v650_v20 }
 0x60f   :  { %674 = vperm.xlu1 %858, %v659_v22   ;;  %667 = vperm.xlu0 %857, %v659_v22  }
 0x613   :  { %859 = vset.pattern.permute.xlu1 %v894_v13  ;;  %860 = vset.pattern.permute.xlu0 %v893_v11  ;;  %v678_v11 = vpop.permute.xlu1 %677  ;;  %v696_v13 = vpop.permute.xlu0 %695 }
 0x614   :  { %683 = vperm.xlu1 %859, %v659_v22   ;;  %692 = vperm.xlu0 %860, %v659_v22  }
 0x618   :  { %861 = vset.pattern.permute.xlu1 %v896_v15  ;;  %862 = vset.pattern.permute.xlu0 %v897_v16 }
 0x619   :  { %701 = vperm.xlu1 %861, %v659_v22   ;;  %710 = vperm.xlu0 %862, %v659_v22  }
 0x61d   :  { %863 = vset.pattern.permute.xlu1 %v895_v14  ;;  %704 = vrot.lane.b32.xlu0 %v1150_v48, %s902_s18  ;;  %v687_v14 = vpop.permute.xlu1 %686 }
 0x61e   :  { %719 = vperm.xlu1 %863, %v659_v22   ;;  %865 = vset.pattern.permute.xlu0 %v898_v17 }
 0x621   :  { %722 = vrot.lane.b32.xlu0 %v1150_v48, %s903_s19 }
 0x622   :  { %864 = vset.pattern.permute.xlu1 %v898_v17 }
 0x623   :  { %728 = vperm.xlu1 %864, %v659_v22  }
 0x625   :  { %275 = vrot.lane.b32.xlu0 %v997_v31, %s906_s22 }
 0x627   :  { %713 = vrot.lane.b32.xlu1 %v1150_v48, %s904_s20 }
 0x629   :  { %427 = vrot.lane.b32.xlu0 %v1060_v32, %s907_s23 }
 0x62b   :  { %731 = vrot.lane.b32.xlu1 %v1150_v48, %s905_s21 }
 0x62d   :  { %585 = vrot.lane.b32.xlu0 %v1128_v47, %s908_s24 }
 0x62f   :  { %351 = vrot.lane.b32.xlu1 %v1033_v55, %s909_s25 }
 0x633   :  { %508 = vrot.lane.b32.xlu1 %v1097_v6, %s910_s26 }
 0x637   :  { %661 = vrot.lane.b32.xlu1 %v659_v22, %s911_s27 }
 0x68e   :  { %v675_v15 = vpop.permute.xlu1 %674  ;;  %v668_v16 = vpop.permute.xlu0 %667 }
 0x68f   :  { %v680_v23 = vmul.f32 %v678_v11, %v675_v15  ;;  %v672_v26 = vmul.f32 %v1150_v48, %v668_v16 }
 0x691   :  { %v681_v29 = vadd.f32 %v680_v23, %v672_v26 }
 0x693   :  { %v684_v17 = vpop.permute.xlu1 %683  ;;  %v693_v31 = vpop.permute.xlu0 %692 }
 0x694   :  { %v689_v28 = vmul.f32 %v687_v14, %v684_v17  ;;  %v698_v33 = vmul.f32 %v696_v13, %v693_v31 }
 0x696   :  { %v690_v6 = vadd.f32 %v689_v28, %v681_v29 }
 0x698   :  { %v702_v32 = vpop.permute.xlu1 %701  ;;  %v711_v7 = vpop.permute.xlu0 %710  ;;  %v699_v36 = vadd.f32 %v698_v33, %v690_v6 }
 0x69c   :  { %v705_v27 = vpop.permute.xlu0 %704 }
 0x69d   :  { %v720_v55 = vpop.permute.xlu1 %719  ;;  %v707_v34 = vmul.f32 %v705_v27, %v702_v32 }
 0x69f   :  { %v708_v38 = vadd.f32 %v707_v34, %v699_v36 }
 0x6a0   :  { %v723_v30 = vpop.permute.xlu0 %722 }
 0x6a1   :  { %v725_v40 = vmul.f32 %v723_v30, %v720_v55 }
 0x6a2   :  { %v729_v25 = vpop.permute.xlu1 %728 }
 0x6a4   :  { %v276_v35 = vpop.permute.xlu0 %275 }
 0x6a5   :  { %279 = vst.msk [vmem:[#allocation3] sm:$0x3] %vm278_vm5, %v276_v35 }
 0x6a6   :  { %v714_v37 = vpop.permute.xlu1 %713 }
 0x6a7   :  { %v716_v39 = vmul.f32 %v714_v37, %v711_v7 }
 0x6a8   :  { %v428_v45 = vpop.permute.xlu0 %427 }
 0x6a9   :  { %v717_v41 = vadd.f32 %v716_v39, %v708_v38 }
 0x6aa   :  { %v732_v42 = vpop.permute.xlu1 %731 }
 0x6ab   :  { %v726_v43 = vadd.f32 %v725_v40, %v717_v41  ;;  %v734_v44 = vmul.f32 %v732_v42, %v729_v25 }
 0x6ac   :  { %v586_v2 = vpop.permute.xlu0 %585 }
 0x6ad   :  { %v735_v46 = vadd.f32 %v734_v44, %v726_v43 }
 0x6ae   :  { %v352_v47 = vpop.permute.xlu1 %351 }
 0x6af   :  { %742 = vst.msk [vmem:[#allocation2] sm:$0x3] %vm21_vm0, %v735_v46  ;;  %737 = vrot.lane.b32.xlu0 %v735_v46, %s912_s28 }
 0x6b0   :  { %355 = vst.msk [vmem:[#allocation3] sm:$0x3] %vm354_vm6, %v352_v47 }
 0x6b1   :  { %431 = vst.msk [vmem:[#allocation3] sm:$0x3] %vm430_vm7, %v428_v45 }
 0x6b2   :  { %v509_v48 = vpop.permute.xlu1 %508 }
 0x6b3   :  { %512 = vst.msk [vmem:[#allocation3] sm:$0x3] %vm511_vm8, %v509_v48 }
 0x6b4   :  { %589 = vst.msk [vmem:[#allocation3] sm:$0x3] %vm588_vm9, %v586_v2 }
 0x6b6   :  { %v662_v24 = vpop.permute.xlu1 %661 }
 0x6b7   :  { %665 = vst.msk [vmem:[#allocation3] sm:$0x3] %vm664_vm10, %v662_v24 }
 0x721   :  { %v738_v49 = vpop.permute.xlu0 %737 }
 0x722   :  { %741 = vst.msk [vmem:[#allocation3] sm:$0x3] %vm740_vm11, %v738_v49 }
 0x723   :  { %877 = shalt.err (!%p874_p4)
}
 0x724   :  { %s878_s6 = scalar_lea.hbm %s1200_s2, 32 }
 0x725   :  { %p879_p5 = scmp.ne.s32.totalorder %s1200_s2, %s878_s6  ;;  %p882_p6 = scmp.lt.u32.totalorder %s878_s6, %s1200_s2 }
 0x727   :  { %p884_p7 = pnand %p882_p6, %p879_p5 }
 0x729   :  { %887 = shalt.err (!%p884_p7)
}
 0x72a   :  { %752 = dma.vmem_to_hbm [thread:$0]  %s750_s30, 32, %s1200_s2, [#allocation4]  }
 0x72b   :  { %888 = dma.done.wait [#allocation4], 32  }
 0x72c   :  { %889 = vsyncadd [#allocation4], 4294967264 }
 0x72d   :  { %756 = vsyncpa [#allocation4], 1 }

</bundles_post_ra>
